<compile_context>
chip_gen: v7x
topology: tpu7x:2x2x1
jax: 0.10.0
libtpu: 0.0.40
codegen_flags: <defaults>
</compile_context>

<pallas_src>
import functools
from collections import defaultdict

import numpy as np
import jax
import jax.numpy as jnp
from jax.experimental import pallas as pl
from jax.experimental.pallas import tpu as pltpu


def _round_up(x, m):
    return ((x + m - 1) // m) * m


# ----------------------------------------------------------------------------
# Kernel 1: weighted cross-entropy (F.cross_entropy with class weights),
# gridded over rows, temperature scale folded into the kernel.
# ----------------------------------------------------------------------------
def _weighted_ce_kernel(logits_ref, tgt_ref, w_ref, out_ref, num_acc, den_acc,
                        *, inv_temp, n_valid, tile_n):
    step = pl.program_id(0)

    @pl.when(step == 0)
    def _init():
        num_acc[...] = jnp.zeros_like(num_acc)
        den_acc[...] = jnp.zeros_like(den_acc)

    x = logits_ref[...].astype(jnp.float32) * inv_temp       # [TN, C]
    tgt = tgt_ref[...]                                        # [TN, 1] i32
    w = w_ref[...]                                            # [1, C]  f32

    row_id = step * tile_n + jax.lax.broadcasted_iota(jnp.int32, (x.shape[0], 1), 0)
    row_ok = row_id < n_valid                                 # mask padded / stale rows

    m = jnp.max(x, axis=-1, keepdims=True)
    lse = m + jnp.log(jnp.sum(jnp.exp(x - m), axis=-1, keepdims=True))   # [TN,1]
    cls = jax.lax.broadcasted_iota(jnp.int32, x.shape, 1)
    onehot = (cls == tgt).astype(jnp.float32)
    tgt_logit = jnp.sum(x * onehot, axis=-1, keepdims=True)
    wt = jnp.sum(w * onehot, axis=-1, keepdims=True)
    nll = lse - tgt_logit

    num_acc[...] += jnp.sum(jnp.where(row_ok, wt * nll, 0.0))
    den_acc[...] += jnp.sum(jnp.where(row_ok, wt, 0.0))

    @pl.when(step == pl.num_programs(0) - 1)
    def _fin():
        out_ref[...] = num_acc[...] / den_acc[...]


def weighted_cross_entropy(logits, targets_np, weights, inv_temperature, tile_n=512):
    """logits [N,C] (any float dtype, unscaled), targets_np numpy int [N],
    weights [C] -> scalar weighted-mean CE loss (scaled by inv_temperature)."""
    N, C = logits.shape
    n_pad = _round_up(N, 8)
    tn = min(tile_n, n_pad)
    if n_pad != N:
        logits = jnp.pad(logits, ((0, n_pad - N), (0, 0)))
    tgt = np.zeros((n_pad, 1), np.int32)
    tgt[:N, 0] = np.asarray(targets_np, np.int32)

    kernel = functools.partial(_weighted_ce_kernel,
                               inv_temp=float(inv_temperature),
                               n_valid=N, tile_n=tn)
    out = pl.pallas_call(
        kernel,
        out_shape=jax.ShapeDtypeStruct((1, 1), jnp.float32),
        grid_spec=pltpu.PrefetchScalarGridSpec(
            num_scalar_prefetch=0,
            grid=(pl.cdiv(n_pad, tn),),
            in_specs=[pl.BlockSpec((tn, C), lambda i: (i, 0)),
                      pl.BlockSpec((tn, 1), lambda i: (i, 0)),
                      pl.BlockSpec((1, C), lambda i: (0, 0))],
            out_specs=pl.BlockSpec((1, 1), lambda i: (0, 0)),
            scratch_shapes=[pltpu.VMEM((1, 1), jnp.float32),
                            pltpu.VMEM((1, 1), jnp.float32)]),
        compiler_params=pltpu.CompilerParams(
            dimension_semantics=("arbitrary",)),
    )(logits, jnp.asarray(tgt), weights.reshape(1, C).astype(jnp.float32))
    return out[0, 0]


# ----------------------------------------------------------------------------
# Kernel 2: matched-box losses (sum of L1 and sum of (1 - GIoU)).
# Boxes in [4, Npad] layout (coords on sublanes, boxes on lanes); padded lanes
# hold identical dummy boxes so they contribute exactly zero.
# ----------------------------------------------------------------------------
def _box_loss_kernel(src_ref, tgt_ref, l1_ref, giou_ref):
    s = src_ref[...]   # [4, N] cxcywh
    t = tgt_ref[...]
    l1_ref[0, 0] = jnp.sum(jnp.abs(s - t))

    def xyxy(b):
        cx, cy, w, h = b[0:1, :], b[1:2, :], b[2:3, :], b[3:4, :]
        return cx - 0.5 * w, cy - 0.5 * h, cx + 0.5 * w, cy + 0.5 * h

    sx0, sy0, sx1, sy1 = xyxy(s)
    tx0, ty0, tx1, ty1 = xyxy(t)
    area_s = (sx1 - sx0) * (sy1 - sy0)
    area_t = (tx1 - tx0) * (ty1 - ty0)
    iw = jnp.maximum(jnp.minimum(sx1, tx1) - jnp.maximum(sx0, tx0), 0.0)
    ih = jnp.maximum(jnp.minimum(sy1, ty1) - jnp.maximum(sy0, ty0), 0.0)
    inter = iw * ih
    union = area_s + area_t - inter
    iou = inter / union
    ew = jnp.maximum(jnp.maximum(sx1, tx1) - jnp.minimum(sx0, tx0), 0.0)
    eh = jnp.maximum(jnp.maximum(sy1, ty1) - jnp.minimum(sy0, ty0), 0.0)
    earea = ew * eh
    giou = iou - (earea - union) / earea
    giou_ref[0, 0] = jnp.sum(1.0 - giou)


def box_losses(src_boxes, tgt_boxes_np):
    """src_boxes [N,4] device f32, tgt_boxes_np [N,4] numpy -> (l1_sum, giou_sum)."""
    n = src_boxes.shape[0]
    n_pad = max(128, _round_up(n, 128))
    # Pad with identical dummy boxes (0.5,0.5,0.5,0.5): L1 and 1-GIoU are 0.
    src = jnp.full((n_pad, 4), 0.5, jnp.float32).at[:n].set(
        src_boxes.astype(jnp.float32))
    tgt = np.full((4, n_pad), 0.5, np.float32)
    tgt[:, :n] = np.asarray(tgt_boxes_np, np.float32).T

    l1, giou = pl.pallas_call(
        _box_loss_kernel,
        out_shape=(jax.ShapeDtypeStruct((1, 1), jnp.float32),
                   jax.ShapeDtypeStruct((1, 1), jnp.float32)),
        in_specs=[pl.BlockSpec(memory_space=pltpu.MemorySpace.VMEM)] * 2,
        out_specs=(pl.BlockSpec(memory_space=pltpu.MemorySpace.VMEM),
                   pl.BlockSpec(memory_space=pltpu.MemorySpace.VMEM)),
    )(src.T, jnp.asarray(tgt))
    return l1[0, 0], giou[0, 0]


# ----------------------------------------------------------------------------
# Kernel 3: contrastive loss, tiled over M (clip rows).
#   row direction (category->query): complete per tile, accumulated scalar.
#   column direction (query->category): online (flash-style) logsumexp + sums
#   held in [1, BQp] f32 VMEM scratch, finalized on the last tile.
# The 1/temperature scale is folded into the clip-row L2 normalization so the
# MXU output needs no extra elementwise scale pass.
# ----------------------------------------------------------------------------
def _contrastive_kernel(emb_ref, clip_ref, pos_ref, out_ref,
                        nom_c, np_c, m_c, s_c, row_acc,
                        *, inv_temp, temp, scale_by_temp, m_valid, bq_valid, tile_m):
    step = pl.program_id(0)

    @pl.when(step == 0)
    def _init():
        nom_c[...] = jnp.zeros_like(nom_c)
        np_c[...] = jnp.zeros_like(np_c)
        m_c[...] = jnp.full_like(m_c, -1e30)
        s_c[...] = jnp.zeros_like(s_c)
        row_acc[...] = jnp.zeros_like(row_acc)

    # Normalize the clip tile in f32 (EUP rsqrt), fold 1/T into the scale,
    # feed the MXU in bf16.  Accumulation stays f32.
    clip = clip_ref[...].astype(jnp.float32)                       # [TM, Dp]
    inv_n = jax.lax.rsqrt(
        jnp.maximum(jnp.sum(clip * clip, axis=1, keepdims=True), 1e-24)) * inv_temp
    clip_n = (clip * inv_n).astype(jnp.bfloat16)
    emb_n = emb_ref[...]                                           # [BQp, Dp] bf16

    logits = jax.lax.dot_general(
        clip_n, emb_n, (((1,), (1,)), ((), ())),
        preferred_element_type=jnp.float32)                        # [TM, BQp] f32

    shp = logits.shape
    row_ok = (step * tile_m
              + jax.lax.broadcasted_iota(jnp.int32, (shp[0], 1), 0)) < m_valid
    col_ok = jax.lax.broadcasted_iota(jnp.int32, (1, shp[1]), 1) < bq_valid
    valid = jnp.logical_and(row_ok, col_ok)                        # [TM, BQp]

    lg = jnp.where(valid, logits, jnp.float32(-1e30))
    pos = jnp.where(valid, pos_ref[...].astype(jnp.float32), 0.0)
    nom = -(lg * pos)                                              # -logits where pos

    # category -> query direction (rows are complete within this M tile)
    nom_r = jnp.sum(nom, axis=1, keepdims=True)
    np_r = jnp.sum(pos, axis=1, keepdims=True)
    m_r = jnp.max(lg, axis=1, keepdims=True)
    lse_r = m_r + jnp.log(jnp.sum(jnp.exp(lg - m_r), axis=1, keepdims=True))
    has_r = np_r > 0
    row_acc[...] += jnp.sum(
        jnp.where(has_r, nom_r / jnp.where(has_r, np_r, 1.0) + lse_r, 0.0))

    # query -> category direction (online accumulation across M tiles)
    nom_c[...] += jnp.sum(nom, axis=0, keepdims=True)
    np_c[...] += jnp.sum(pos, axis=0, keepdims=True)
    new_m = jnp.maximum(m_c[...], jnp.max(lg, axis=0, keepdims=True))
    s_c[...] = (s_c[...] * jnp.exp(m_c[...] - new_m)
                + jnp.sum(jnp.exp(lg - new_m), axis=0, keepdims=True))
    m_c[...] = new_m

    @pl.when(step == pl.num_programs(0) - 1)
    def _fin():
        lse_c = m_c[...] + jnp.log(s_c[...])
        npc = np_c[...]
        has_c = npc > 0
        col_loss = jnp.sum(
            jnp.where(has_c, nom_c[...] / jnp.where(has_c, npc, 1.0) + lse_c, 0.0))
        total = (row_acc[...] + col_loss) * 0.5
        if scale_by_temp:
            total = total * temp
        out_ref[...] = total


def contrastive_pallas(emb_flat, clip_feat, pos_map_np, temperature,
                       scale_by_temperature, tile_m=512):
    """emb_flat [BQ, D] device, clip_feat [M, D] device,
    pos_map_np [M, BQp] int8 numpy (BQp = round_up(BQ,128)) -> scalar loss."""
    BQ, D = emb_flat.shape
    M = clip_feat.shape[0]
    Dp = _round_up(max(D, 128), 128)
    BQp = pos_map_np.shape[1]
    TM = M if M <= tile_m else tile_m       # tile_m is a multiple of 32

    # Normalize the (small) query embeddings once, pad lane/contraction dims,
    # cast to bf16 for the MXU.  Accumulation stays f32 in-kernel.
    emb32 = emb_flat.astype(jnp.float32)
    emb_n = emb32 * jax.lax.rsqrt(
        jnp.maximum(jnp.sum(emb32 * emb32, axis=1, keepdims=True), 1e-24))
    emb_n = jnp.pad(emb_n, ((0, BQp - BQ), (0, Dp - D))).astype(jnp.bfloat16)

    clip32 = clip_feat.astype(jnp.float32)
    if Dp != D:
        clip32 = jnp.pad(clip32, ((0, 0), (0, Dp - D)))

    kernel = functools.partial(_contrastive_kernel,
                               inv_temp=float(1.0 / temperature),
                               temp=float(temperature),
                               scale_by_temp=bool(scale_by_temperature),
                               m_valid=M, bq_valid=BQ, tile_m=TM)
    out = pl.pallas_call(
        kernel,
        out_shape=jax.ShapeDtypeStruct((1, 1), jnp.float32),
        grid_spec=pltpu.PrefetchScalarGridSpec(
            num_scalar_prefetch=0,
            grid=(pl.cdiv(M, TM),),
            in_specs=[pl.BlockSpec((BQp, Dp), lambda i: (0, 0)),   # emb (resident)
                      pl.BlockSpec((TM, Dp), lambda i: (i, 0)),    # clip tile
                      pl.BlockSpec((TM, BQp), lambda i: (i, 0))],  # pos tile (int8)
            out_specs=pl.BlockSpec((1, 1), lambda i: (0, 0)),
            scratch_shapes=[pltpu.VMEM((1, BQp), jnp.float32),     # nom_c
                            pltpu.VMEM((1, BQp), jnp.float32),     # np_c
                            pltpu.VMEM((1, BQp), jnp.float32),     # m_c (running max)
                            pltpu.VMEM((1, BQp), jnp.float32),     # s_c (running sum)
                            pltpu.VMEM((1, 1), jnp.float32)]),     # row-direction acc
        compiler_params=pltpu.CompilerParams(
            dimension_semantics=("arbitrary",),
            vmem_limit_bytes=32 * 1024 * 1024),
    )(emb_n, clip32, jnp.asarray(pos_map_np))
    return out[0, 0]


# ----------------------------------------------------------------------------
# Host-side glue (mirrors the PyTorch control flow of SetCriterion_bak)
# ----------------------------------------------------------------------------
def _build_masks(targets, select_id):
    masks = []
    for t in targets:
        labels = np.asarray(t['labels'])
        m = (labels == -2)
        for ind, v in enumerate(labels):
            if int(v) in select_id:
                m[ind] = True
        masks.append(m)
    return masks


def _build_pos_map(outputs, targets, indices, masks, Q, M, width=None):
    select_id = outputs['select_id']
    cat2idx = {c: i for i, c in enumerate(select_id)}
    tar_pos_index = defaultdict(list)
    for b, (t, (src, tgt), m) in enumerate(zip(targets, indices, masks)):
        labels = np.asarray(t['labels'])
        src = np.asarray(src)
        tgt = np.asarray(tgt)
        cats = labels[tgt][m[tgt]].tolist()     # faithful to original (uses m[tgt])
        srcs = src[m].tolist()                  # faithful to original (uses m)
        for this_cat, this_src in zip(cats, srcs):
            tar_pos_index[this_cat].append(b * Q + this_src)
    B = len(targets)
    if width is None:
        width = B * Q
    pos_map = np.zeros((M, width), np.int8)
    for cat, idxs in tar_pos_index.items():
        pos_map[cat2idx[cat] * 200, np.asarray(idxs, np.int64)] = 1
    return pos_map


class SetCriterionPallas:
    """JAX/Pallas forward-pass equivalent of SetCriterion_bak.

    # TODO(synk): the Hungarian matcher is a sequential, data-dependent
    # algorithm with no clean Pallas equivalent; matching `indices` are passed
    # in explicitly (fixed/deterministic here).
    """

    def __init__(self, num_classes, weight_dict, losses, focal_gamma=0.5,
                 focal_alpha=0.25, eos_coef=0.1, temperature=0.07,
                 scale_by_temperature=True):
        self.num_classes = num_classes
        self.weight_dict = weight_dict
        self.losses = losses
        self.eos_coef = eos_coef
        self.focal_gamma = focal_gamma
        self.focal_alpha = focal_alpha
        self.temperature = temperature
        self.scale_by_temperature = scale_by_temperature
        ew = np.ones(num_classes + 1, np.float32)
        ew[-1] = eos_coef
        self.empty_weight = jnp.asarray(ew)

    # ------------------------------------------------------------------
    def loss_labels(self, outputs, targets, indices, num_boxes):
        logits = outputs['pred_logits']            # raw; 1/T folded into kernel
        B, Q, Cp1 = logits.shape
        target_classes = np.full((B, Q), self.num_classes, np.int32)
        b_idx, s_idx, t_lab = [], [], []
        for b, (t, (src, tgt)) in enumerate(zip(targets, indices)):
            lab = np.asarray(t['labels'])[np.asarray(tgt)]
            target_classes[b, np.asarray(src)] = lab
            b_idx.append(np.full(len(src), b))
            s_idx.append(np.asarray(src))
            t_lab.append(lab)
        b_idx = np.concatenate(b_idx)
        s_idx = np.concatenate(s_idx)
        t_lab = np.concatenate(t_lab)

        loss_ce = weighted_cross_entropy(
            logits.reshape(B * Q, Cp1),
            target_classes.reshape(-1),
            self.empty_weight,
            1.0 / self.temperature)

        # accuracy / class_error (argmax unaffected by temperature scale)
        matched = logits[b_idx, s_idx]                       # [Nm, C+1]
        acc = jnp.mean((jnp.argmax(matched, axis=-1)
                        == jnp.asarray(t_lab)).astype(jnp.float32)) * 100.0
        return {'loss_ce': loss_ce, 'class_error': 100.0 - acc}

    # ------------------------------------------------------------------
    def loss_boxes(self, outputs, targets, indices, num_boxes):
        b_idx = np.concatenate([np.full(len(src), b)
                                for b, (src, _) in enumerate(indices)])
        s_idx = np.concatenate([np.asarray(src) for src, _ in indices])
        src_boxes = outputs['pred_boxes'][b_idx, s_idx]
        tgt_boxes = np.concatenate(
            [np.asarray(t['boxes'], np.float32)[np.asarray(tgt)]
             for t, (_, tgt) in zip(targets, indices)], axis=0)
        l1_sum, giou_sum = box_losses(src_boxes, tgt_boxes)
        return {'loss_bbox': l1_sum / num_boxes,
                'loss_giou': giou_sum / num_boxes}

    # ------------------------------------------------------------------
    def loss_contrastive(self, outputs, targets, indices, num_boxes, masks):
        pred_embed = outputs['pred_embed']
        B, Q, D = pred_embed.shape
        clip_feat = outputs['clip_feat']
        M = clip_feat.shape[0]
        BQp = _round_up(max(B * Q, 128), 128)
        pos_map = _build_pos_map(outputs, targets, indices, masks, Q, M, width=BQp)
        loss = contrastive_pallas(pred_embed.reshape(B * Q, D), clip_feat, pos_map,
                                  self.temperature, self.scale_by_temperature)
        return {'loss_contrastive': loss}

    # ------------------------------------------------------------------
    def forward(self, outputs, targets, indices):
        select_id = outputs['select_id']
        masks = _build_masks(targets, select_id)
        num_boxes = sum(int(m.sum()) for m in masks)
        # TODO(synk): distributed all_reduce of num_boxes not applicable (world_size == 1).
        num_boxes = max(float(num_boxes), 1.0)

        losses = {}
        for loss in self.losses:
            if loss == 'labels':
                losses.update(self.loss_labels(outputs, targets, indices, num_boxes))
            elif loss == 'boxes':
                losses.update(self.loss_boxes(outputs, targets, indices, num_boxes))
            elif loss == 'contrastive':
                losses.update(self.loss_contrastive(outputs, targets, indices,
                                                    num_boxes, masks))
            # TODO(synk): 'masks' loss (bilinear interpolate + nested tensors)
            # is not implemented; not exercised here.
        return losses


# ----------------------------------------------------------------------------
# Pure numpy reference (mirrors the PyTorch math) for correctness checking.
# ----------------------------------------------------------------------------
def _reference(outputs, targets, indices, crit, num_boxes):
    B, Q, Cp1 = outputs['pred_logits'].shape
    logits = np.asarray(outputs['pred_logits'], np.float64) / crit.temperature
    tc = np.full((B, Q), crit.num_classes, np.int64)
    for b, (t, (src, tgt)) in enumerate(zip(targets, indices)):
        tc[b, np.asarray(src)] = np.asarray(t['labels'])[np.asarray(tgt)]
    x = logits.reshape(-1, Cp1)
    mx = x.max(-1, keepdims=True)
    lse = (np.log(np.exp(x - mx).sum(-1, keepdims=True)) + mx)[:, 0]
    nll = lse - x[np.arange(x.shape[0]), tc.reshape(-1)]
    w = np.asarray(crit.empty_weight, np.float64)[tc.reshape(-1)]
    ref_ce = (w * nll).sum() / w.sum()

    b_idx = np.concatenate([np.full(len(s), b) for b, (s, _) in enumerate(indices)])
    s_idx = np.concatenate([np.asarray(s) for s, _ in indices])
    sb = np.asarray(outputs['pred_boxes'], np.float64)[b_idx, s_idx]
    tb = np.concatenate([np.asarray(t['boxes'], np.float64)[np.asarray(tg)]
                         for t, (_, tg) in zip(targets, indices)])
    ref_l1 = np.abs(sb - tb).sum() / num_boxes

    def xyxy(b):
        return np.stack([b[:, 0] - b[:, 2] / 2, b[:, 1] - b[:, 3] / 2,
                         b[:, 0] + b[:, 2] / 2, b[:, 1] + b[:, 3] / 2], -1)
    s, t_ = xyxy(sb), xyxy(tb)
    a1 = (s[:, 2] - s[:, 0]) * (s[:, 3] - s[:, 1])
    a2 = (t_[:, 2] - t_[:, 0]) * (t_[:, 3] - t_[:, 1])
    iw = np.clip(np.minimum(s[:, 2], t_[:, 2]) - np.maximum(s[:, 0], t_[:, 0]), 0, None)
    ih = np.clip(np.minimum(s[:, 3], t_[:, 3]) - np.maximum(s[:, 1], t_[:, 1]), 0, None)
    inter = iw * ih
    union = a1 + a2 - inter
    iou = inter / union
    ew = np.clip(np.maximum(s[:, 2], t_[:, 2]) - np.minimum(s[:, 0], t_[:, 0]), 0, None)
    eh = np.clip(np.maximum(s[:, 3], t_[:, 3]) - np.minimum(s[:, 1], t_[:, 1]), 0, None)
    ea = ew * eh
    giou = iou - (ea - union) / ea
    ref_giou = (1 - giou).sum() / num_boxes

    D = outputs['pred_embed'].shape[-1]
    emb = np.asarray(outputs['pred_embed'], np.float64).reshape(-1, D)
    clip = np.asarray(outputs['clip_feat'], np.float64)
    emb_n = emb / np.maximum(np.linalg.norm(emb, axis=1, keepdims=True), 1e-12)
    clip_n = clip / np.maximum(np.linalg.norm(clip, axis=1, keepdims=True), 1e-12)
    lg = clip_n @ emb_n.T / crit.temperature
    masks = _build_masks(targets, outputs['select_id'])
    pos = _build_pos_map(outputs, targets, indices, masks, Q,
                         clip.shape[0]).astype(np.float64)
    nom = -(lg * pos)

    def lse_ax(a, ax):
        m = a.max(ax)
        return m + np.log(np.exp(a - np.expand_dims(m, ax)).sum(ax))

    npr = pos.sum(1); hr = npr > 0
    l_r = (nom.sum(1)[hr] / npr[hr]).sum() + lse_ax(lg, 1)[hr].sum()
    npc = pos.sum(0); hc = npc > 0
    l_c = (nom.sum(0)[hc] / npc[hc]).sum() + lse_ax(lg, 0)[hc].sum()
    tot = (l_r + l_c) / 2
    if crit.scale_by_temperature:
        tot *= crit.temperature
    return {'loss_ce': ref_ce, 'loss_bbox': ref_l1, 'loss_giou': ref_giou,
            'loss_contrastive': tot}


# ----------------------------------------------------------------------------
if __name__ == "__main__":
    key = jax.random.PRNGKey(0)
    B, Q, C, D = 2, 8, 16, 32
    select_id = [3, 7]
    M = len(select_id) * 200   # module hard-codes 200 clip features per category

    k1, k2, k3, k4 = jax.random.split(key, 4)
    pred_logits = jax.random.normal(k1, (B, Q, C + 1), jnp.float32)
    pred_boxes = jax.random.uniform(k2, (B, Q, 4), jnp.float32, 0.2, 0.4)  # cxcywh
    pred_embed = jax.random.normal(k3, (B, Q, D), jnp.float32)
    clip_feat = jax.random.normal(k4, (M, D), jnp.float32)

    outputs = {'pred_logits': pred_logits, 'pred_boxes': pred_boxes,
               'pred_embed': pred_embed, 'clip_feat': clip_feat,
               'select_id': select_id}
    targets = [
        {'labels': np.array([3, 11, 7], np.int32),
         'boxes': np.array([[0.3, 0.4, 0.2, 0.2],
                            [0.6, 0.5, 0.15, 0.25],
                            [0.5, 0.5, 0.3, 0.1]], np.float32)},
        {'labels': np.array([7, 2], np.int32),
         'boxes': np.array([[0.4, 0.3, 0.2, 0.3],
                            [0.7, 0.6, 0.1, 0.2]], np.float32)},
    ]
    # Deterministic matching (stand-in for the Hungarian matcher output).
    indices = [(np.array([5, 0, 2]), np.array([1, 2, 0])),
               (np.array([1, 4]), np.array([0, 1]))]

    criterion = SetCriterionPallas(num_classes=C, weight_dict={},
                                   losses=['labels', 'boxes', 'contrastive'])
    losses = criterion.forward(outputs, targets, indices)
    losses = {k: jax.block_until_ready(v) for k, v in losses.items()}

    num_boxes = max(float(sum(int(m.sum()) for m in _build_masks(targets, select_id))), 1.0)
    ref = _reference(outputs, targets, indices, criterion, num_boxes)
    for k_, v_ in ref.items():
        np.testing.assert_allclose(np.asarray(losses[k_], np.float64), v_,
                                   rtol=3e-2, atol=3e-2)

    print("KERNEL_OK")
</pallas_src>

<mosaic_0001>
module attributes {stable_mosaic.version = 11 : i64} {
  func.func @_weighted_ce_kernel(%arg0: i32, %arg1: memref<16x17xf32, #tpu.memory_space<vmem>>, %arg2: memref<16x1xi32, #tpu.memory_space<vmem>>, %arg3: memref<1x17xf32, #tpu.memory_space<vmem>>, %arg4: memref<1x1xf32, #tpu.memory_space<vmem>>, %arg5: memref<1x1xf32, #tpu.memory_space<vmem>>, %arg6: memref<1x1xf32, #tpu.memory_space<vmem>>) attributes {dimension_semantics = [#tpu.dimension_semantics<arbitrary>], iteration_bounds = array<i64: 1>, scalar_prefetch = 0 : i64, scratch_operands = 2 : i64, tpu.core_type = #tpu.core_type<tc>, window_params = [{transform_indices = @transform_0, window_bounds = array<i64: 16, 17>}, {transform_indices = @transform_1, window_bounds = array<i64: 16, 1>}, {pipeline_mode = #tpu.pipeline_mode<synchronous>, transform_indices = @transform_2, window_bounds = array<i64: 1, 17>}, {pipeline_mode = #tpu.pipeline_mode<synchronous>, transform_indices = @transform_3, window_bounds = array<i64: 1, 1>}]} {
    %c0_i32 = arith.constant 0 : i32
    %0 = arith.cmpi eq, %arg0, %c0_i32 : i32
    %1 = arith.extui %0 : i1 to i32
    %c0_i32_0 = arith.constant 0 : i32
    %2 = arith.cmpi ne, %1, %c0_i32_0 : i32
    scf.if %2 {
      %cst_25 = arith.constant 0.000000e+00 : f32
      %60 = vector.broadcast %cst_25 : f32 to vector<1x1xf32>
      %c0_26 = arith.constant 0 : index
      %c0_27 = arith.constant 0 : index
      %61 = vector.load %arg5[%c0_26, %c0_27] : memref<1x1xf32, #tpu.memory_space<vmem>>, vector<1x1xf32>
      tpu.vector_store %arg5[%c0_26, %c0_27], %60 {strides = array<i32>} : memref<1x1xf32, #tpu.memory_space<vmem>>, vector<1x1xf32>,
      %cst_28 = arith.constant 0.000000e+00 : f32
      %62 = vector.broadcast %cst_28 : f32 to vector<1x1xf32>
      %c0_29 = arith.constant 0 : index
      %c0_30 = arith.constant 0 : index
      %63 = vector.load %arg6[%c0_29, %c0_30] : memref<1x1xf32, #tpu.memory_space<vmem>>, vector<1x1xf32>
      tpu.vector_store %arg6[%c0_29, %c0_30], %62 {strides = array<i32>} : memref<1x1xf32, #tpu.memory_space<vmem>>, vector<1x1xf32>,
    } else {
    }
    %c0 = arith.constant 0 : index
    %c0_1 = arith.constant 0 : index
    %3 = vector.load %arg1[%c0, %c0_1] : memref<16x17xf32, #tpu.memory_space<vmem>>, vector<16x17xf32>
    %cst = arith.constant 14.2857141 : f32
    %4 = vector.broadcast %cst : f32 to vector<16x17xf32>
    %5 = arith.mulf %3, %4 : vector<16x17xf32>
    %c0_2 = arith.constant 0 : index
    %c0_3 = arith.constant 0 : index
    %6 = vector.load %arg2[%c0_2, %c0_3] : memref<16x1xi32, #tpu.memory_space<vmem>>, vector<16x1xi32>
    %c0_4 = arith.constant 0 : index
    %c0_5 = arith.constant 0 : index
    %7 = vector.load %arg3[%c0_4, %c0_5] : memref<1x17xf32, #tpu.memory_space<vmem>>, vector<1x17xf32>
    %c16_i32 = arith.constant 16 : i32
    %8 = arith.muli %arg0, %c16_i32 : i32
    %9 = tpu.iota {dimensions = array<i32: 0>} : vector<16x1xi32>
    %10 = vector.broadcast %8 : i32 to vector<16x1xi32>
    %11 = arith.addi %10, %9 : vector<16x1xi32>
    %c16_i32_6 = arith.constant 16 : i32
    %12 = vector.broadcast %c16_i32_6 : i32 to vector<16x1xi32>
    %13 = arith.cmpi slt, %11, %12 : vector<16x1xi32>
    %cst_7 = arith.constant dense<0xFF800000> : vector<16xf32>
    %14 = vector.multi_reduction <maximumf>, %5, %cst_7 [1] : vector<16x17xf32> to vector<16xf32>
    %15 = vector.shape_cast %14 : vector<16xf32> to vector<16x1xf32>
    %16 = vector.broadcast %15 : vector<16x1xf32> to vector<16x17xf32>
    %17 = arith.subf %5, %16 : vector<16x17xf32>
    %18 = math.exp %17 : vector<16x17xf32>
    %cst_8 = arith.constant dense<0.000000e+00> : vector<16xf32>
    %19 = vector.multi_reduction <add>, %18, %cst_8 [1] : vector<16x17xf32> to vector<16xf32>
    %20 = vector.shape_cast %19 : vector<16xf32> to vector<16x1xf32>
    %21 = math.log %20 : vector<16x1xf32>
    %22 = arith.addf %15, %21 : vector<16x1xf32>
    %23 = tpu.iota {dimensions = array<i32: 1>} : vector<16x17xi32>
    %24 = vector.broadcast %6 : vector<16x1xi32> to vector<16x17xi32>
    %25 = arith.cmpi eq, %23, %24 : vector<16x17xi32>
    %26 = arith.extui %25 : vector<16x17xi1> to vector<16x17xi32>
    %27 = arith.sitofp %26 : vector<16x17xi32> to vector<16x17xf32>
    %28 = arith.mulf %5, %27 : vector<16x17xf32>
    %cst_9 = arith.constant dense<0.000000e+00> : vector<16xf32>
    %29 = vector.multi_reduction <add>, %28, %cst_9 [1] : vector<16x17xf32> to vector<16xf32>
    %30 = vector.shape_cast %29 : vector<16xf32> to vector<16x1xf32>
    %31 = vector.broadcast %7 : vector<1x17xf32> to vector<16x17xf32>
    %32 = arith.mulf %31, %27 : vector<16x17xf32>
    %cst_10 = arith.constant dense<0.000000e+00> : vector<16xf32>
    %33 = vector.multi_reduction <add>, %32, %cst_10 [1] : vector<16x17xf32> to vector<16xf32>
    %34 = vector.shape_cast %33 : vector<16xf32> to vector<16x1xf32>
    %35 = arith.subf %22, %30 : vector<16x1xf32>
    %c0_11 = arith.constant 0 : index
    %c0_12 = arith.constant 0 : index
    %36 = vector.load %arg5[%c0_11, %c0_12] : memref<1x1xf32, #tpu.memory_space<vmem>>, vector<1x1xf32>
    %37 = arith.mulf %34, %35 : vector<16x1xf32>
    %cst_13 = arith.constant 0.000000e+00 : f32
    %38 = vector.broadcast %cst_13 : f32 to vector<16x1xf32>
    %39 = arith.select %13, %37, %38 : vector<16x1xi1>, vector<16x1xf32>
    %40 = vector.shape_cast %39 : vector<16x1xf32> to vector<1x16x1xf32>
    %cst_14 = arith.constant dense<0.000000e+00> : vector<1xf32>
    %41 = vector.multi_reduction <add>, %40, %cst_14 [1, 2] : vector<1x16x1xf32> to vector<1xf32>
    %42 = vector.shape_cast %41 : vector<1xf32> to vector<1x1x1xf32>
    %43 = vector.extract %42[0, 0, 0] : f32 from vector<1x1x1xf32>
    %44 = vector.broadcast %43 : f32 to vector<1x1xf32>
    %45 = arith.addf %36, %44 : vector<1x1xf32>
    %c0_15 = arith.constant 0 : index
    %c0_16 = arith.constant 0 : index
    %46 = vector.load %arg5[%c0_15, %c0_16] : memref<1x1xf32, #tpu.memory_space<vmem>>, vector<1x1xf32>
    tpu.vector_store %arg5[%c0_15, %c0_16], %45 {strides = array<i32>} : memref<1x1xf32, #tpu.memory_space<vmem>>, vector<1x1xf32>,
    %c0_17 = arith.constant 0 : index
    %c0_18 = arith.constant 0 : index
    %47 = vector.load %arg6[%c0_17, %c0_18] : memref<1x1xf32, #tpu.memory_space<vmem>>, vector<1x1xf32>
    %cst_19 = arith.constant 0.000000e+00 : f32
    %48 = vector.broadcast %cst_19 : f32 to vector<16x1xf32>
    %49 = arith.select %13, %34, %48 : vector<16x1xi1>, vector<16x1xf32>
    %50 = vector.shape_cast %49 : vector<16x1xf32> to vector<1x16x1xf32>
    %cst_20 = arith.constant dense<0.000000e+00> : vector<1xf32>
    %51 = vector.multi_reduction <add>, %50, %cst_20 [1, 2] : vector<1x16x1xf32> to vector<1xf32>
    %52 = vector.shape_cast %51 : vector<1xf32> to vector<1x1x1xf32>
    %53 = vector.extract %52[0, 0, 0] : f32 from vector<1x1x1xf32>
    %54 = vector.broadcast %53 : f32 to vector<1x1xf32>
    %55 = arith.addf %47, %54 : vector<1x1xf32>
    %c0_21 = arith.constant 0 : index
    %c0_22 = arith.constant 0 : index
    %56 = vector.load %arg6[%c0_21, %c0_22] : memref<1x1xf32, #tpu.memory_space<vmem>>, vector<1x1xf32>
    tpu.vector_store %arg6[%c0_21, %c0_22], %55 {strides = array<i32>} : memref<1x1xf32, #tpu.memory_space<vmem>>, vector<1x1xf32>,
    %c0_i32_23 = arith.constant 0 : i32
    %57 = arith.cmpi eq, %arg0, %c0_i32_23 : i32
    %58 = arith.extui %57 : i1 to i32
    %c0_i32_24 = arith.constant 0 : i32
    %59 = arith.cmpi ne, %58, %c0_i32_24 : i32
    scf.if %59 {
      %c0_25 = arith.constant 0 : index
      %c0_26 = arith.constant 0 : index
      %60 = vector.load %arg5[%c0_25, %c0_26] : memref<1x1xf32, #tpu.memory_space<vmem>>, vector<1x1xf32>
      %c0_27 = arith.constant 0 : index
      %c0_28 = arith.constant 0 : index
      %61 = vector.load %arg6[%c0_27, %c0_28] : memref<1x1xf32, #tpu.memory_space<vmem>>, vector<1x1xf32>
      %62 = arith.divf %60, %61 : vector<1x1xf32>
      %c0_29 = arith.constant 0 : index
      %c0_30 = arith.constant 0 : index
      %63 = vector.load %arg4[%c0_29, %c0_30] : memref<1x1xf32, #tpu.memory_space<vmem>>, vector<1x1xf32>
      tpu.vector_store %arg4[%c0_29, %c0_30], %62 {strides = array<i32>} : memref<1x1xf32, #tpu.memory_space<vmem>>, vector<1x1xf32>,
    } else {
    }
    return
  }
  func.func @transform_0(%arg0: i32) -> (i32, i32) {
    %c0_i32 = arith.constant 0 : i32
    %c0_i32_0 = arith.constant 0 : i32
    return %arg0, %c0_i32 : i32, i32
  }
  func.func @transform_1(%arg0: i32) -> (i32, i32) {
    %c0_i32 = arith.constant 0 : i32
    %c0_i32_0 = arith.constant 0 : i32
    return %arg0, %c0_i32 : i32, i32
  }
  func.func @transform_2(%arg0: i32) -> (i32, i32) {
    %c0_i32 = arith.constant 0 : i32
    %c0_i32_0 = arith.constant 0 : i32
    %c0_i32_1 = arith.constant 0 : i32
    return %c0_i32, %c0_i32_0 : i32, i32
  }
  func.func @transform_3(%arg0: i32) -> (i32, i32) {
    %c0_i32 = arith.constant 0 : i32
    %c0_i32_0 = arith.constant 0 : i32
    %c0_i32_1 = arith.constant 0 : i32
    return %c0_i32, %c0_i32_0 : i32, i32
  }
}

</mosaic_0001>

<bundles_post_ra>
// kernel: tpu_custom_call.1
= control target key start
LH: loop header
LB: loop body
LE: loop exit
PB: predicated region body
PF: predicated region fallthrough
CT: control target
= control target key end

     0   :  { %vm38_vm0 = vcmask 138240   ;;  %v209_v5 = vmov 0   ;;  %s272_s0 = inlined_call_operand.vmem [shape: f32[16,17], index: 0, kind: input, shape index: {}]   ;;  %s273_s1 = inlined_call_operand.vmem [shape: s32[16,1], index: 1, kind: input, shape index: {}]   ;;  %s274_s2 = inlined_call_operand.vmem [shape: f32[1,17], index: 2, kind: input, shape index: {}]   ;;  %s275_s3 = inlined_call_operand.hbm [shape: f32[1,1], index: 3, kind: output, shape index: {}]  }
   0x1   :  { %v22_v0 = vld [vmem:[%s272_s0] sm:$0xff]  ;;  %v23_v1 = vld [vmem:[%s272_s0 + $0x8] sm:$0xff]  ;;  %173 = vset.pattern.permute.xlu1 %v209_v5  ;;  %174 = vset.pattern.permute.xlu0 %v209_v5 }
   0x2   :  { %v26_v2 = vld [vmem:[%s273_s1] sm:$0xff]  ;;  %v24_v3 = vmul.f32 14.285714, %v22_v0  ;;  %v25_v4 = vmul.f32 14.285714, %v23_v1 }
   0x3   :  { %66 = vperm.xlu1 %173, %v26_v2  }
   0x4   :  { %8 = vsyncpa [#allocation5], 0  ;;  %v39_v6 = vsel %vm38_vm0, %v24_v3, -inf  ;;  %v27_v7 = vld [vmem:[%s273_s1 + $0x8] sm:$0xff]  ;;  %v42_v8 = vsel %vm38_vm0, %v25_v4, -inf  ;;  %v63_v10 = vlaneseq  ;;  %v210_v19 = vmov 0.0  }
   0x5   :  { %40 = vmax.xlane.f32.xlu0 %v39_v6  ;;  %v165_v29 = vld [vmem:[%s274_s2] ss:$0 sm:$0xff]  ;;  %vm106_vm3 = vcmask 7168   ;;  %vm19_vm4 = vcmask 0   ;;  %s211_s21 = smov [#allocation4]  }
   0x6   :  { %v64_v15 = vand.u32 127, %v63_v10  ;;  %20 = vst.msk [vmem:[#allocation2] sm:$0x1] %vm19_vm4, %v210_v19  ;;  %21 = vst.msk [vmem:[#allocation3] sm:$0x1] %vm19_vm4, %v210_v19  ;;  %s155_s22 = sshll.u32 %s211_s21, 4  ;;  %s156_s22 = int_to_ptr.vmem [resolvable:$true] %s155_s22 }
   0x7   :  { %69 = vperm.xlu1 %173, %v27_v7   ;;  %s185_s23 = scalar_lea.vmem %s156_s22, 16  ;;  %s189_s24 = scalar_lea.vmem %s156_s22, 32 }
   0x8   :  { %p186_p0 = scmp.ne.s32.totalorder %s156_s22, %s185_s23  ;;  %p190_p1 = scmp.lt.s32.totalorder %s156_s22, %s156_s22 }
   0x9   :  { %43 = vmax.xlane.f32.xlu0 %v42_v8  ;;  %p191_p2 = scmp.lt.s32.totalorder %s189_s24, %s185_s23 }
   0xb   :  { %p192_p3 = por %p191_p2, %p190_p1 }
   0xd   :  { %v101_v7 = vld [vmem:[#allocation2] sm:$0x1]  ;;  %v123_v10 = vld [vmem:[#allocation3] sm:$0x1]  ;;  %p193_p4 = pnand %p192_p3, %p186_p0 }
  0x82   :  { %v67_v13 = vpop.permute.xlu1 %66 }
  0x83   :  { %vm71_vm1 = vcmp.eq.s32.totalorder %v64_v15, %v67_v13 }
  0x84   :  { %v163_v20 = vsel %vm71_vm1, 1.0, %v210_v19 }
  0x85   :  { %v77_v21 = vmul.f32 %v163_v20, %v24_v3  ;;  %v91_v31 = vmul.f32 %v165_v29, %v163_v20 }
  0x86   :  { %v70_v18 = vpop.permute.xlu1 %69 }
  0x87   :  { %vm72_vm2 = vcmp.eq.s32.totalorder %v64_v15, %v70_v18  ;;  %v79_v25 = vsel %vm38_vm0, %v77_v21, 0.0  ;;  %v93_v32 = vsel %vm38_vm0, %v91_v31, 0.0 }
  0x88   :  { %v164_v23 = vsel %vm72_vm2, 1.0, %v210_v19 }
  0x89   :  { %v78_v26 = vmul.f32 %v164_v23, %v25_v4  ;;  %v92_v33 = vmul.f32 %v165_v29, %v164_v23 }
  0x8b   :  { %v82_v30 = vsel %vm38_vm0, %v78_v26, 0.0  ;;  %v96_v34 = vsel %vm38_vm0, %v92_v33, 0.0 }
  0x92   :  { %v41_v9 = vpop.xlane.xlu0 %40 }
  0x93   :  { %v45_v11 = vsub.f32 %v24_v3, %v41_v9 }
  0x95   :  { %v47_v12 = vmul.f32 1.442695, %v45_v11 }
  0x96   :  { %v44_v14 = vpop.xlane.xlu0 %43 }
  0x97   :  { %175 = vpow2.f32 %v47_v12  ;;  %v46_v16 = vsub.f32 %v25_v4, %v44_v14 }
  0x99   :  { %v49_v17 = vmul.f32 1.442695, %v46_v16 }
  0x9b   :  { %177 = vpow2.f32 %v49_v17 }
  0xa1   :  { %v176_v22 = vpop.eup %175 }
  0xa2   :  { %v51_v24 = vsel %vm38_vm0, %v176_v22, 0.0 }
  0xa3   :  { %52 = vadd.xlane.f32.xlu0 %v51_v24 }
  0xa5   :  { %v178_v27 = vpop.eup %177 }
  0xa6   :  { %v54_v28 = vsel %vm38_vm0, %v178_v27, 0.0 }
  0xa7   :  { %55 = vadd.xlane.f32.xlu1 %v54_v28  ;;  %80 = vadd.xlane.f32.xlu0 %v79_v25 }
  0xab   :  { %83 = vadd.xlane.f32.xlu0 %v82_v30 }
  0xaf   :  { %94 = vadd.xlane.f32.xlu0 %v93_v32 }
  0xb3   :  { %97 = vadd.xlane.f32.xlu0 %v96_v34 }
 0x130   :  { %v53_v35 = vpop.xlane.xlu0 %52 }
 0x131   :  { %179 = vlog2.f32 %v53_v35 }
 0x134   :  { %v56_v36 = vpop.xlane.xlu1 %55  ;;  %v81_v37 = vpop.xlane.xlu0 %80 }
 0x135   :  { %181 = vlog2.f32 %v56_v36 }
 0x138   :  { %v84_v38 = vpop.xlane.xlu0 %83 }
 0x13b   :  { %v180_v39 = vpop.eup %179 }
 0x13c   :  { %v58_v40 = vmul.f32 0.6931472, %v180_v39  ;;  %v95_v43 = vpop.xlane.xlu0 %94 }
 0x13d   :  { %v126_v55 = vsel %vm106_vm3, %v95_v43, 0.0 }
 0x13e   :  { %v61_v41 = vadd.f32 %v58_v40, %v41_v9 }
 0x13f   :  { %v182_v42 = vpop.eup %181 }
 0x140   :  { %v60_v44 = vmul.f32 0.6931472, %v182_v42  ;;  %v99_v45 = vsub.f32 %v61_v41, %v81_v37  ;;  %v98_v49 = vpop.xlane.xlu0 %97 }
 0x141   :  { %v127_v54 = vsel %vm106_vm3, %v98_v49, 0.0 }
 0x142   :  { %v62_v46 = vadd.f32 %v60_v44, %v44_v14  ;;  %v102_v48 = vmul.f32 %v99_v45, %v95_v43  ;;  %v128_v56 = vadd.f32 %v127_v54, %v126_v55 }
 0x144   :  { %v100_v47 = vsub.f32 %v62_v46, %v84_v38  ;;  %v107_v51 = vsel %vm106_vm3, %v102_v48, 0.0 }
 0x146   :  { %v103_v50 = vmul.f32 %v100_v47, %v98_v49 }
 0x148   :  { %v108_v52 = vsel %vm106_vm3, %v103_v50, 0.0 }
 0x149   :  { %v109_v53 = vadd.f32 %v108_v52, %v107_v51 }
 0x14b   :  { %110 = vadd.xlane.f32.xlu0 %v109_v53 }
 0x14f   :  { %129 = vadd.xlane.f32.xlu0 %v128_v56 }
 0x1d8   :  { %v111_v57 = vpop.xlane.xlu0 %110 }
 0x1d9   :  { %v112_v58 = vrot.slane %v111_v57, 4 }
 0x1db   :  { %v113_v59 = vadd.f32 %v112_v58, %v111_v57 }
 0x1dc   :  { %v130_v60 = vpop.xlane.xlu0 %129 }
 0x1dd   :  { %v114_v61 = vrot.slane %v113_v59, 2  ;;  %v131_v62 = vrot.slane %v130_v60, 4 }
 0x1df   :  { %v132_v63 = vadd.f32 %v131_v62, %v130_v60  ;;  %v115_v0 = vadd.f32 %v114_v61, %v113_v59 }
 0x1e1   :  { %v133_v1 = vrot.slane %v132_v63, 2  ;;  %v116_v2 = vrot.slane %v115_v0, 1 }
 0x1e3   :  { %v134_v3 = vadd.f32 %v133_v1, %v132_v63  ;;  %v117_v4 = vadd.f32 %v116_v2, %v115_v0 }
 0x1e5   :  { %166 = vpush %v117_v4  ;;  %v135_v5 = vrot.slane %v134_v3, 1 }
 0x1e7   :  { %v136_v6 = vadd.f32 %v135_v5, %v134_v3 }
 0x1e9   :  { %168 = vpush %v136_v6 }
 0x216   :  { %s167_s2 = spop %166 }
 0x217   :  { %v119_v8 = vstv %s167_s2 }
 0x218   :  { %v120_v9 = vadd.f32 %v119_v8, %v101_v7 }
 0x21a   :  { %122 = vst.msk [vmem:[#allocation2] sm:$0x1] %vm19_vm4, %v120_v9  ;;  %s169_s20 = spop %168 }
 0x21b   :  { %v138_v11 = vstv %s169_s20 }
 0x21c   :  { %v139_v12 = vadd.f32 %v138_v11, %v123_v10 }
 0x21e   :  { %140 = vst.msk [vmem:[#allocation3] sm:$0x1] %vm19_vm4, %v139_v12 }
 0x221   :  { %v144_v15 = vld [vmem:[#allocation2] sm:$0x1] }
 0x225   :  { %v145_v13 = vld [vmem:[#allocation3] sm:$0x1] }
 0x226   :  { %183 = vrcp.f32 %v145_v13 }
 0x230   :  { %v184_v14 = vpop.eup %183 }
 0x231   :  { %v147_v16 = vmul.f32 %v184_v14, %v144_v15 }
 0x233   :  { %148 = vst.msk [vmem:[#allocation4] sm:$0x1] %vm19_vm4, %v147_v16 }
 0x234   :  { %196 = shalt.err (!%p193_p4)
}
 0x235   :  { %s197_s27 = scalar_lea.hbm %s275_s3, 16 }
 0x236   :  { %p198_p5 = scmp.ne.s32.totalorder %s275_s3, %s197_s27  ;;  %p201_p6 = scmp.lt.u32.totalorder %s197_s27, %s275_s3 }
 0x238   :  { %p203_p7 = pnand %p201_p6, %p198_p5 }
 0x23a   :  { %206 = shalt.err (!%p203_p7)
}
 0x23b   :  { %158 = dma.vmem_to_hbm [thread:$0]  %s156_s22, 16, %s275_s3, [#allocation5]  }
 0x23c   :  { %207 = dma.done.wait [#allocation5], 16  }
 0x23d   :  { %208 = vsyncadd [#allocation5], 4294967280 }
 0x23e   :  { %162 = vsyncpa [#allocation5], 1 }

</bundles_post_ra>
